<compile_context>
chip_gen: v7x
topology: tpu7x:2x2x1
jax: 0.10.0
libtpu: 0.0.40
codegen_flags: <defaults>
</compile_context>

<pallas_src>
import functools

import jax
import jax.numpy as jnp
from jax.experimental import pallas as pl
from jax.experimental.pallas import tpu as pltpu


LANE_PAD = 128  # pad the 4-wide output to a full lane group for dense stores


def fused_linear_kernel(x_ref, w_ref, b_ref, o_ref):
    # out = x @ W + b  with W already fused/padded: (TILE_B,300)@(300,128)->(TILE_B,128)
    acc = jnp.dot(x_ref[...], w_ref[...], preferred_element_type=jnp.float32)
    o_ref[...] = (acc + b_ref[...]).astype(o_ref.dtype)


def prepare_params(w1, b1, w2, b2, pad_to=LANE_PAD):
    """One-time param prep: fuse the two affine layers and pad to 128 lanes.

    w1: (32,300), b1: (32,), w2: (4,32), b2: (4,)  (PyTorch nn.Linear layout)
    Returns (w_fused_padded (300,128), b_fused_padded (1,128), out_dim).
    """
    w_fused = w1.T @ w2.T                 # (300, 4)
    b_fused = b1 @ w2.T + b2              # (4,)
    in_dim, out_dim = w_fused.shape
    w_pad = jnp.zeros((in_dim, pad_to), w_fused.dtype).at[:, :out_dim].set(w_fused)
    b_pad = jnp.zeros((1, pad_to), b_fused.dtype).at[0, :out_dim].set(b_fused)
    return w_pad, b_pad, out_dim


def _choose_tile_b(batch):
    # Multiple of 8 (f32 sublane); cap at 2048 rows so double-buffered x tiles
    # (2048*300*4B ~= 2.4 MiB each) fit comfortably within scoped VMEM on
    # v5e (16 MiB default) as well as v6e/v7x (32 MiB default).
    tb = ((batch + 7) // 8) * 8
    return max(8, min(2048, tb))


@functools.partial(jax.jit, static_argnames=("out_dim",))
def mlp_forward(x, w_pad, b_pad, out_dim):
    """x: (B, 300) f32; w_pad: (300, 128); b_pad: (1, 128). Returns (B, out_dim)."""
    batch, in_dim = x.shape
    pad = w_pad.shape[1]
    tile_b = _choose_tile_b(batch)
    grid = (pl.cdiv(batch, tile_b),)

    out_padded = pl.pallas_call(
        fused_linear_kernel,
        out_shape=jax.ShapeDtypeStruct((batch, pad), x.dtype),
        grid_spec=pltpu.PrefetchScalarGridSpec(
            num_scalar_prefetch=0,
            grid=grid,
            in_specs=[
                # x: tiled over batch, double-buffered by the Pallas pipeline.
                pl.BlockSpec((tile_b, in_dim), lambda i: (i, 0)),
                # fused weight: constant index_map -> stays resident in VMEM.
                pl.BlockSpec((in_dim, pad), lambda i: (0, 0)),
                # fused bias: resident in VMEM.
                pl.BlockSpec((1, pad), lambda i: (0, 0)),
            ],
            out_specs=pl.BlockSpec((tile_b, pad), lambda i: (i, 0)),
        ),
        compiler_params=pltpu.CompilerParams(
            dimension_semantics=("parallel",),
        ),
        cost_estimate=pl.CostEstimate(
            flops=2 * batch * in_dim * pad,
            transcendentals=0,
            bytes_accessed=(batch * in_dim + in_dim * pad + pad + batch * pad) * 4,
        ),
    )(x, w_pad, b_pad)

    # Slice the lane-padded output back to the true (B, 4).
    return out_padded[:, :out_dim]


def init_params(key):
    """Deterministic init mimicking PyTorch nn.Linear default (U[-1/sqrt(fan_in), +])."""
    k1, k2, k3, k4 = jax.random.split(key, 4)
    bound1 = 1.0 / jnp.sqrt(300.0)
    bound2 = 1.0 / jnp.sqrt(32.0)
    w1 = jax.random.uniform(k1, (32, 300), jnp.float32, -bound1, bound1)
    b1 = jax.random.uniform(k2, (32,), jnp.float32, -bound1, bound1)
    w2 = jax.random.uniform(k3, (4, 32), jnp.float32, -bound2, bound2)
    b2 = jax.random.uniform(k4, (4,), jnp.float32, -bound2, bound2)
    return w1, b1, w2, b2


if __name__ == "__main__":
    key = jax.random.PRNGKey(0)
    kx, kp = jax.random.split(key)
    B = 8
    x = jax.random.normal(kx, (B, 300), jnp.float32)
    w1, b1, w2, b2 = init_params(kp)

    # One-time parameter prep (fusion + transpose + lane padding), outside hot path.
    w_pad, b_pad, out_dim = prepare_params(w1, b1, w2, b2)

    out = mlp_forward(x, w_pad, b_pad, out_dim)
    jax.block_until_ready(out)

    # Reference check: same math as the PyTorch module (two un-fused affines).
    ref = (x @ w1.T + b1) @ w2.T + b2
    assert out.shape == (B, 4)
    assert jnp.allclose(out, ref, atol=1e-3, rtol=1e-3)

    print("KERNEL_OK")
</pallas_src>

<mosaic_0001>
module attributes {stable_mosaic.version = 11 : i64} {
  func.func @fused_linear_kernel(%arg0: i32, %arg1: memref<8x300xf32, #tpu.memory_space<vmem>>, %arg2: memref<300x128xf32, #tpu.memory_space<vmem>>, %arg3: memref<1x128xf32, #tpu.memory_space<vmem>>, %arg4: memref<8x128xf32, #tpu.memory_space<vmem>>) attributes {dimension_semantics = [#tpu.dimension_semantics<parallel>], iteration_bounds = array<i64: 1>, scalar_prefetch = 0 : i64, scratch_operands = 0 : i64, tpu.core_type = #tpu.core_type<tc>, window_params = [{transform_indices = @transform_0, window_bounds = array<i64: 8, 300>}, {pipeline_mode = #tpu.pipeline_mode<synchronous>, transform_indices = @transform_1, window_bounds = array<i64: 300, 128>}, {pipeline_mode = #tpu.pipeline_mode<synchronous>, transform_indices = @transform_2, window_bounds = array<i64: 1, 128>}, {transform_indices = @transform_3, window_bounds = array<i64: 8, 128>}]} {
    %c0 = arith.constant 0 : index
    %c0_0 = arith.constant 0 : index
    %0 = vector.load %arg1[%c0, %c0_0] : memref<8x300xf32, #tpu.memory_space<vmem>>, vector<8x300xf32>
    %c0_1 = arith.constant 0 : index
    %c0_2 = arith.constant 0 : index
    %1 = vector.load %arg2[%c0_1, %c0_2] : memref<300x128xf32, #tpu.memory_space<vmem>>, vector<300x128xf32>
    %cst = arith.constant dense<0.000000e+00> : vector<8x128xf32>
    %2 = tpu.matmul %0, %1, %cst {dimension_numbers = #tpu.dot_dimension_numbers<[1], [0], [0], [1], [0, 0, 1, 1], [], []>} : vector<8x300xf32>, vector<300x128xf32>, vector<8x128xf32> -> vector<8x128xf32>
    %c0_3 = arith.constant 0 : index
    %c0_4 = arith.constant 0 : index
    %3 = vector.load %arg3[%c0_3, %c0_4] : memref<1x128xf32, #tpu.memory_space<vmem>>, vector<1x128xf32>
    %4 = vector.broadcast %3 : vector<1x128xf32> to vector<8x128xf32>
    %5 = arith.addf %2, %4 : vector<8x128xf32>
    %c0_5 = arith.constant 0 : index
    %c0_6 = arith.constant 0 : index
    %6 = vector.load %arg4[%c0_5, %c0_6] : memref<8x128xf32, #tpu.memory_space<vmem>>, vector<8x128xf32>
    tpu.vector_store %arg4[%c0_5, %c0_6], %5 {strides = array<i32>} : memref<8x128xf32, #tpu.memory_space<vmem>>, vector<8x128xf32>,
    return
  }
  func.func @transform_0(%arg0: i32) -> (i32, i32) {
    %c0_i32 = arith.constant 0 : i32
    %c0_i32_0 = arith.constant 0 : i32
    return %arg0, %c0_i32 : i32, i32
  }
  func.func @transform_1(%arg0: i32) -> (i32, i32) {
    %c0_i32 = arith.constant 0 : i32
    %c0_i32_0 = arith.constant 0 : i32
    %c0_i32_1 = arith.constant 0 : i32
    return %c0_i32, %c0_i32_0 : i32, i32
  }
  func.func @transform_2(%arg0: i32) -> (i32, i32) {
    %c0_i32 = arith.constant 0 : i32
    %c0_i32_0 = arith.constant 0 : i32
    %c0_i32_1 = arith.constant 0 : i32
    return %c0_i32, %c0_i32_0 : i32, i32
  }
  func.func @transform_3(%arg0: i32) -> (i32, i32) {
    %c0_i32 = arith.constant 0 : i32
    %c0_i32_0 = arith.constant 0 : i32
    return %arg0, %c0_i32 : i32, i32
  }
}

</mosaic_0001>

<bundles_post_ra>
// kernel: mlp_forward.1
= control target key start
LH: loop header
LB: loop body
LE: loop exit
PB: predicated region body
PF: predicated region fallthrough
CT: control target
= control target key end

     0   :  { %8 = vsyncpa [#allocation3], 0  ;;  %s469_s0 = inlined_call_operand.hbm [shape: f32[8,300], index: 0, kind: input, shape index: {}]   ;;  %s470_s1 = inlined_call_operand.hbm [shape: f32[300,128], index: 1, kind: input, shape index: {}]   ;;  %s471_s2 = inlined_call_operand.vmem [shape: f32[1,128], index: 2, kind: input, shape index: {}]   ;;  %s472_s3 = inlined_call_operand.vmem [shape: f32[8,128], index: 3, kind: output, shape index: {}]  }
   0x1   :  { %9 = vsyncpa [#allocation5], 0  ;;  %s401_s12 = smov [#allocation2]   ;;  %s402_s14 = smov [#allocation4]  }
   0x2   :  { %s16_s13 = sshll.u32 %s401_s12, 4  ;;  %s25_s15 = sshll.u32 %s402_s14, 4  ;;  %s17_s13 = int_to_ptr.vmem [resolvable:$true] %s16_s13  ;;  %s429_s15 = int_to_ptr.vmem [resolvable:$true] %s25_s15 }
   0x3   :  { %s353_s18 = scalar_lea.hbm %s469_s0, 384 }
   0x4   :  { %p354_p0 = scmp.ne.s32.totalorder %s469_s0, %s353_s18  ;;  %p357_p1 = scmp.lt.u32.totalorder %s353_s18, %s469_s0 }
   0x6   :  { %p359_p2 = pnand %p357_p1, %p354_p0 }
   0x8   :  { %362 = shalt.err (!%p359_p2)
}
   0x9   :  { %s363_s23 = scalar_lea.vmem %s17_s13, 384  ;;  %p368_p4 = scmp.lt.s32.totalorder %s17_s13, %s17_s13 }
   0xa   :  { %p364_p3 = scmp.ne.s32.totalorder %s17_s13, %s363_s23  ;;  %p369_p5 = scmp.lt.s32.totalorder %s363_s23, %s363_s23 }
   0xc   :  { %p370_p6 = por %p369_p5, %p368_p4 }
   0xe   :  { %p371_p7 = pnand %p370_p6, %p364_p3 }
  0x10   :  { %374 = shalt.err (!%p371_p7)
}
  0x11   :  { %19 = dma.hbm_to_vmem [thread:$0]  %s469_s0, 384, %s17_s13, [#allocation3]  }
  0x12   :  { %s375_s28 = scalar_lea.hbm %s470_s1, 4864 }
  0x13   :  { %p376_p8 = scmp.ne.s32.totalorder %s470_s1, %s375_s28  ;;  %p379_p9 = scmp.lt.u32.totalorder %s375_s28, %s470_s1 }
  0x15   :  { %p381_p10 = pnand %p379_p9, %p376_p8 }
  0x17   :  { %384 = shalt.err (!%p381_p10)
}
  0x18   :  { %s385_s6 = scalar_lea.vmem %s429_s15, 4864  ;;  %p390_p12 = scmp.lt.s32.totalorder %s429_s15, %s429_s15 }
  0x19   :  { %p386_p11 = scmp.ne.s32.totalorder %s429_s15, %s385_s6  ;;  %p391_p13 = scmp.lt.s32.totalorder %s385_s6, %s385_s6 }
  0x1b   :  { %p392_p0 = por %p391_p13, %p390_p12 }
  0x1d   :  { %p393_p1 = pnand %p392_p0, %p386_p11 }
  0x1f   :  { %396 = shalt.err (!%p393_p1)
}
  0x20   :  { %s403_s0 = smov 128   ;;  %s404_s7 = smov 8  }
  0x21   :  { %31 = dma.hbm_to_vmem [thread:$0]  %s470_s1, 4864, %s429_s15, [#allocation5], %s403_s0, %s403_s0, %s404_s7  }
  0x22   :  { %397 = dma.done.wait [#allocation3], 384  }
  0x23   :  { %398 = vsyncadd [#allocation3], 4294966912 }
  0x24   :  { %399 = dma.done.wait [#allocation5], 4864  }
  0x25   :  { %400 = vsyncadd [#allocation5], 4294962432  ;;  %v405_v0 = vmov 0.0|0.0   ;;  %vm406_vm0 = vmmov 0   ;;  %v407_v1 = vmov 0.0   ;;  %v59_v2 = vld [vmem:[#allocation4 + $0x80] sm:$0xff] }
  0x26   :  { %335 = vmatprep.subr.bf16.mxu1 %v405_v0  ;;  %300 = vmatprep.mubr.msk.f32.mxu1 %vm406_vm0, %v407_v1  ;;  %v60_v3 = vld [vmem:[#allocation4 + $0x88] sm:$0xff]  ;;  %v43_v4 = vld [vmem:[#allocation4] sm:$0xff]  ;;  %v61_v7 = vld [vmem:[#allocation4 + $0x90] sm:$0xff]  ;;  %vm92_vm1 = vcmask 1043456   ;;  %vm408_vm2 = vmmov 1   ;;  %vm88_vm4 = vcmask 359424  }
  0x27   :  { %v303_v5 = vpack.c.bf16 %v60_v3, %v59_v2  ;;  %v44_v6 = vld [vmem:[#allocation4 + $0x8] sm:$0xff]  ;;  %v62_v8 = vld [vmem:[#allocation4 + $0x98] sm:$0xff]  ;;  %v45_v11 = vld [vmem:[#allocation4 + $0x10] sm:$0xff] }
  0x28   :  { %v305_v9 = vpack.c.bf16 %v44_v6, %v43_v4  ;;  %v307_v10 = vpack.c.bf16 %v62_v8, %v61_v7  ;;  %v46_v12 = vld [vmem:[#allocation4 + $0x18] sm:$0xff]  ;;  %v63_v13 = vld [vmem:[#allocation4 + $0xa0] sm:$0xff]  ;;  %v64_v14 = vld [vmem:[#allocation4 + $0xa8] sm:$0xff] }
  0x29   :  { %304 = vmatprep.subr.bf16.mxu0 %v303_v5  ;;  %v309_v15 = vpack.c.bf16 %v46_v12, %v45_v11  ;;  %v311_v16 = vpack.c.bf16 %v64_v14, %v63_v13  ;;  %v47_v17 = vld [vmem:[#allocation4 + $0x20] sm:$0xff]  ;;  %v48_v18 = vld [vmem:[#allocation4 + $0x28] sm:$0xff]  ;;  %v65_v19 = vld [vmem:[#allocation4 + $0xb0] sm:$0xff] }
  0x2a   :  { %306 = vmatpush3.bf16.msra.mxu0 %v305_v9  ;;  %v66_v20 = vld [vmem:[#allocation4 + $0xb8] sm:$0xff]  ;;  %v313_v21 = vpack.c.bf16 %v48_v18, %v47_v17  ;;  %v49_v22 = vld [vmem:[#allocation4 + $0x30] sm:$0xff]  ;;  %v75_v25 = vld [vmem:[#allocation4 + $0x100] sm:$0xff] }
  0x2b   :  { %308 = vmatprep.subr.bf16.mxu0 %v307_v10  ;;  %v315_v23 = vpack.c.bf16 %v66_v20, %v65_v19  ;;  %v50_v24 = vld [vmem:[#allocation4 + $0x38] sm:$0xff]  ;;  %v76_v26 = vld [vmem:[#allocation4 + $0x108] sm:$0xff]  ;;  %v67_v27 = vld [vmem:[#allocation4 + $0xc0] sm:$0xff] }
  0x2c   :  { %v68_v28 = vld [vmem:[#allocation4 + $0xc8] sm:$0xff]  ;;  %v336_v29 = vpack.c.bf16 %v76_v26, %v75_v25  ;;  %v77_v30 = vld [vmem:[#allocation4 + $0x110] sm:$0xff]  ;;  %v78_v31 = vld [vmem:[#allocation4 + $0x118] sm:$0xff]  ;;  %v317_v32 = vpack.c.bf16 %v50_v24, %v49_v22 }
  0x2d   :  { %v51_v33 = vld [vmem:[#allocation4 + $0x40] sm:$0xff]  ;;  %v339_v34 = vpack.c.bf16 %v78_v31, %v77_v30  ;;  %v41_v35 = vld [vmem:[#allocation2 + $0x8] sm:$0xff]  ;;  %v319_v36 = vpack.c.bf16 %v68_v28, %v67_v27  ;;  %v52_v37 = vld [vmem:[#allocation4 + $0x48] sm:$0xff] }
  0x2e   :  { %310 = vmatpush3.bf16.msra.mxu0 %v309_v15  ;;  %337 = vmatpush3.bf16.msra.mxu1 %v336_v29  ;;  %v79_v38 = vld [vmem:[#allocation4 + $0x120] sm:$0xff]  ;;  %v80_v39 = vld [vmem:[#allocation4 + $0x128] sm:$0xf]  ;;  %v69_v40 = vld [vmem:[#allocation4 + $0xd0] sm:$0xff]  ;;  %v321_v42 = vpack.c.bf16 %v52_v37, %v51_v33 }
  0x2f   :  { %312 = vmatprep.subr.bf16.mxu0 %v311_v16  ;;  %338 = vmatprep.subr.bf16.mxu1 %v405_v0  ;;  %v70_v41 = vld [vmem:[#allocation4 + $0xd8] sm:$0xff]  ;;  %v342_v43 = vpack.c.bf16 %v80_v39, %v79_v38  ;;  %v53_v45 = vld [vmem:[#allocation4 + $0x50] sm:$0xff]  ;;  %vm343_vm3 = vmpackc.low %vm92_vm1, %vm408_vm2 }
  0x30   :  { %160 = vmatprep.mubr.f32.mxu0 %v41_v35  ;;  %v323_v44 = vpack.c.bf16 %v70_v41, %v69_v40  ;;  %v54_v46 = vld [vmem:[#allocation4 + $0x58] sm:$0xff]  ;;  %v71_v47 = vld [vmem:[#allocation4 + $0xe0] sm:$0xff]  ;;  %v72_v48 = vld [vmem:[#allocation4 + $0xe8] sm:$0xff] }
  0x31   :  { %v325_v49 = vpack.c.bf16 %v54_v46, %v53_v45  ;;  %v42_v50 = vld [vmem:[#allocation2 + $0x10] sm:$0xff]  ;;  %v327_v51 = vpack.c.bf16 %v72_v48, %v71_v47  ;;  %v55_v52 = vld [vmem:[#allocation4 + $0x60] sm:$0xff]  ;;  %v56_v53 = vld [vmem:[#allocation4 + $0x68] sm:$0xff] }
  0x32   :  { %314 = vmatpush3.bf16.msra.mxu0 %v313_v21  ;;  %340 = vmatpush3.bf16.msra.mxu1 %v339_v34  ;;  %v73_v54 = vld [vmem:[#allocation4 + $0xf0] sm:$0xff]  ;;  %v74_v55 = vld [vmem:[#allocation4 + $0xf8] sm:$0xff]  ;;  %v329_v56 = vpack.c.bf16 %v56_v53, %v55_v52  ;;  %v40_v61 = vld [vmem:[#allocation2] sm:$0xff] }
  0x33   :  { %316 = vmatprep.subr.bf16.mxu0 %v315_v23  ;;  %341 = vmatprep.subr.bf16.mxu1 %v405_v0  ;;  %v331_v57 = vpack.c.bf16 %v74_v55, %v73_v54  ;;  %v57_v58 = vld [vmem:[#allocation4 + $0x70] sm:$0xff]  ;;  %v58_v59 = vld [vmem:[#allocation4 + $0x78] sm:$0xff]  ;;  %v243_v2 = vld [vmem:[%s471_s2] ss:$0 sm:$0xff] }
  0x34   :  { %v333_v60 = vpack.c.bf16 %v58_v59, %v57_v58 }
  0x36   :  { %318 = vmatpush3.bf16.msra.mxu0 %v317_v32  ;;  %344 = vmatpush3.bf16.msk.msra.mxu1 %vm343_vm3, %v342_v43 }
  0x37   :  { %320 = vmatprep.subr.bf16.mxu0 %v319_v36 }
  0x39   :  { %301 = vmatmul.mubr.msk.f32.vlgmr.msra.gmra.mrb[0].mxu1 %vm88_vm4, %v42_v50 }
  0x3a   :  { %322 = vmatpush3.bf16.msra.mxu0 %v321_v42 }
  0x3b   :  { %324 = vmatprep.subr.bf16.mxu0 %v323_v44 }
  0x3e   :  { %326 = vmatpush3.bf16.msra.mxu0 %v325_v49 }
  0x3f   :  { %328 = vmatprep.subr.bf16.mxu0 %v327_v51 }
  0x42   :  { %330 = vmatpush3.bf16.msra.mxu0 %v329_v56 }
  0x43   :  { %332 = vmatprep.subr.bf16.mxu0 %v331_v57 }
  0x46   :  { %334 = vmatpush3.bf16.msra.mxu0 %v333_v60 }
  0x49   :  { %161 = vmatmul.mubr.f32.vlgmr.msra.gmra.mrb[0].mxu0 %v40_v61 }
 0x10c   :  { %v232_v62 = vpop.f32.mrb[0].mxu1 }
 0x10d   :  { %v302_v63 = vpop.f32.mrb[1].mxu1 }
 0x11c   :  { %v278_v0 = vpop.f32.mrb[0].mxu0 }
 0x11d   :  { %v279_v1 = vpop.f32.mrb[1].mxu0 }
 0x11e   :  { %v280_v3 = vadd.f32 %v279_v1, %v278_v0 }
 0x120   :  { %v163_v4 = vadd.f32 %v280_v3, %v243_v2 }
 0x122   :  { %v233_v5 = vadd.f32 %v232_v62, %v163_v4 }
 0x124   :  { %236 = vst [vmem:[%s472_s3] sm:$0xff] %v233_v5 }
 0x125   :  { %241 = vsyncpa [#allocation3], 1 }
 0x126   :  { %242 = vsyncpa [#allocation5], 1 }

</bundles_post_ra>
